<compile_context>
chip_gen: v6e
topology: v6e:2x2x1
jax: 0.10.0
libtpu: 0.0.40
codegen_flags: <defaults>
</compile_context>

<pallas_src>
import jax
import jax.numpy as jnp
from jax.experimental import pallas as pl
from jax.experimental.pallas import tpu as pltpu

IN_DIM = 12
H1 = 128
H2 = 128
OUT_DIM = 64


def _mlp_kernel(x_ref,
                w1_ref, s1_ref, b1_ref,
                w2_ref, s2_ref, b2_ref,
                w3_ref, s3_ref, b3_ref,
                o_ref):
    # Layer 1: Linear(12 -> 128) + folded BN + ReLU   (Dropout p=0.7 -> identity)
    h = jnp.dot(x_ref[...], w1_ref[...], preferred_element_type=jnp.float32)
    h = jnp.maximum(h * s1_ref[...] + b1_ref[...], 0.0)

    # Layer 2: Linear(128 -> 128) + folded BN + ReLU  (Dropout p=0.5 -> identity)
    h = jnp.dot(h.astype(w2_ref.dtype), w2_ref[...],
                preferred_element_type=jnp.float32)
    h = jnp.maximum(h * s2_ref[...] + b2_ref[...], 0.0)

    # Layer 3: Linear(128 -> 64) + folded BN + ReLU
    h = jnp.dot(h.astype(w3_ref.dtype), w3_ref[...],
                preferred_element_type=jnp.float32)
    h = jnp.maximum(h * s3_ref[...] + b3_ref[...], 0.0)

    o_ref[...] = h.astype(o_ref.dtype)


def feat_l_coad_forward(x, params, *, tile_b=512):
    """Fused 3-layer MLP.  x: (B, 12) float32 -> (B, 64) float32."""
    (w1, s1, b1, w2, s2, b2, w3, s3, b3) = params
    B = x.shape[0]
    # If the batch is smaller than one tile, use a single full-batch block
    # (block == full dim is always a legal BlockSpec).  Otherwise tile_b is a
    # multiple of 8; the last ragged tile is masked by Pallas automatically.
    tile_b = min(tile_b, B)
    grid = (pl.cdiv(B, tile_b),)

    # bf16 matmul inputs -> native MXU passes + halved x/weight DMA bytes.
    x_bf16 = x.astype(jnp.bfloat16)

    def const(shape):
        return pl.BlockSpec(shape, lambda i: (0, 0))

    in_specs = [
        pl.BlockSpec((tile_b, IN_DIM), lambda i: (i, 0)),   # x (pipelined)
        const(w1.shape), const(s1.shape), const(b1.shape),  # resident params
        const(w2.shape), const(s2.shape), const(b2.shape),
        const(w3.shape), const(s3.shape), const(b3.shape),
    ]
    out_spec = pl.BlockSpec((tile_b, OUT_DIM), lambda i: (i, 0))

    return pl.pallas_call(
        _mlp_kernel,
        out_shape=jax.ShapeDtypeStruct((B, OUT_DIM), jnp.float32),
        grid=grid,
        in_specs=in_specs,
        out_specs=out_spec,
        compiler_params=pltpu.CompilerParams(
            dimension_semantics=("parallel",)),
    )(x_bf16, w1, s1, b1, w2, s2, b2, w3, s3, b3)


def _xavier_uniform(key, fan_in, fan_out):
    # Matches torch.nn.init.xavier_uniform_ (gain=1).
    limit = jnp.sqrt(6.0 / (fan_in + fan_out))
    # Torch Linear weight is (out, in); stored transposed (in, out) for x @ W.
    return jax.random.uniform(key, (fan_in, fan_out), jnp.float32, -limit, limit)


def _make_params(key):
    """Deterministic parameter construction + BN/bias folding."""
    dims = [(IN_DIM, H1), (H1, H2), (H2, OUT_DIM)]
    eps = 1e-5
    params = []
    keys = jax.random.split(key, 5 * len(dims))
    for li, (fin, fout) in enumerate(dims):
        k_w, k_b, k_g, k_be, k_m = keys[5 * li:5 * li + 5]
        w = _xavier_uniform(k_w, fin, fout)                          # (in, out)
        # Torch Linear bias default: U(-1/sqrt(fan_in), 1/sqrt(fan_in))
        bound = 1.0 / jnp.sqrt(jnp.float32(fin))
        b_lin = jax.random.uniform(k_b, (fout,), jnp.float32, -bound, bound)
        # BatchNorm1d parameters / running stats (deterministic, non-trivial).
        gamma = 1.0 + 0.1 * jax.random.normal(k_g, (fout,), jnp.float32)
        beta = 0.1 * jax.random.normal(k_be, (fout,), jnp.float32)
        run_mean = 0.05 * jax.random.normal(k_m, (fout,), jnp.float32)
        run_var = jnp.ones((fout,), jnp.float32)
        # Fold: y = ((x@W + b_lin) - mean) / sqrt(var+eps) * gamma + beta
        #         = (x@W) * scale + shift
        scale = gamma / jnp.sqrt(run_var + eps)
        shift = (b_lin - run_mean) * scale + beta
        params.extend([
            w.astype(jnp.bfloat16),            # bf16 weights for the MXU
            scale.reshape(1, fout),            # f32 scale
            shift.reshape(1, fout),            # f32 shift
        ])
    return tuple(params)


def _reference_forward(x, params):
    """Pure-JAX reference with the same bf16-rounded matmul operands."""
    (w1, s1, b1, w2, s2, b2, w3, s3, b3) = params
    h = x.astype(jnp.bfloat16).astype(jnp.float32)
    for (w, s, b) in ((w1, s1, b1), (w2, s2, b2), (w3, s3, b3)):
        h = h @ w.astype(jnp.float32)
        h = jnp.maximum(h * s + b, 0.0)
        h = h.astype(jnp.bfloat16).astype(jnp.float32)  # mirror kernel casts
    return h


if __name__ == "__main__":
    key = jax.random.PRNGKey(0)
    k_params, k_x = jax.random.split(key)

    params = _make_params(k_params)

    B = 8  # small batch
    x = jax.random.normal(k_x, (B, IN_DIM), jnp.float32)

    out = feat_l_coad_forward(x, params)
    out = jax.block_until_ready(out)

    assert out.shape == (B, OUT_DIM), out.shape
    assert out.dtype == jnp.float32, out.dtype

    # Numerical sanity check against a pure-JAX reference (bf16-matched).
    ref = jax.block_until_ready(_reference_forward(x, params))
    err = float(jnp.max(jnp.abs(out - ref)))
    assert err < 5e-2, f"max abs error {err}"

    print("KERNEL_OK")
</pallas_src>

<mosaic_0001>
module attributes {stable_mosaic.version = 11 : i64} {
  func.func @_mlp_kernel(%arg0: i32, %arg1: memref<8x12xbf16, #tpu.memory_space<vmem>>, %arg2: memref<12x128xbf16, #tpu.memory_space<vmem>>, %arg3: memref<1x128xf32, #tpu.memory_space<vmem>>, %arg4: memref<1x128xf32, #tpu.memory_space<vmem>>, %arg5: memref<128x128xbf16, #tpu.memory_space<vmem>>, %arg6: memref<1x128xf32, #tpu.memory_space<vmem>>, %arg7: memref<1x128xf32, #tpu.memory_space<vmem>>, %arg8: memref<128x64xbf16, #tpu.memory_space<vmem>>, %arg9: memref<1x64xf32, #tpu.memory_space<vmem>>, %arg10: memref<1x64xf32, #tpu.memory_space<vmem>>, %arg11: memref<8x64xf32, #tpu.memory_space<vmem>>) attributes {dimension_semantics = [#tpu.dimension_semantics<parallel>], iteration_bounds = array<i64: 1>, scalar_prefetch = 0 : i64, scratch_operands = 0 : i64, tpu.core_type = #tpu.core_type<tc>, window_params = [{transform_indices = @transform_0, window_bounds = array<i64: 8, 12>}, {pipeline_mode = #tpu.pipeline_mode<synchronous>, transform_indices = @transform_1, window_bounds = array<i64: 12, 128>}, {pipeline_mode = #tpu.pipeline_mode<synchronous>, transform_indices = @transform_2, window_bounds = array<i64: 1, 128>}, {pipeline_mode = #tpu.pipeline_mode<synchronous>, transform_indices = @transform_3, window_bounds = array<i64: 1, 128>}, {pipeline_mode = #tpu.pipeline_mode<synchronous>, transform_indices = @transform_4, window_bounds = array<i64: 128, 128>}, {pipeline_mode = #tpu.pipeline_mode<synchronous>, transform_indices = @transform_5, window_bounds = array<i64: 1, 128>}, {pipeline_mode = #tpu.pipeline_mode<synchronous>, transform_indices = @transform_6, window_bounds = array<i64: 1, 128>}, {pipeline_mode = #tpu.pipeline_mode<synchronous>, transform_indices = @transform_7, window_bounds = array<i64: 128, 64>}, {pipeline_mode = #tpu.pipeline_mode<synchronous>, transform_indices = @transform_8, window_bounds = array<i64: 1, 64>}, {pipeline_mode = #tpu.pipeline_mode<synchronous>, transform_indices = @transform_9, window_bounds = array<i64: 1, 64>}, {transform_indices = @transform_10, window_bounds = array<i64: 8, 64>}]} {
    %c0 = arith.constant 0 : index
    %c0_0 = arith.constant 0 : index
    %0 = vector.load %arg1[%c0, %c0_0] : memref<8x12xbf16, #tpu.memory_space<vmem>>, vector<8x12xbf16>
    %c0_1 = arith.constant 0 : index
    %c0_2 = arith.constant 0 : index
    %1 = vector.load %arg2[%c0_1, %c0_2] : memref<12x128xbf16, #tpu.memory_space<vmem>>, vector<12x128xbf16>
    %cst = arith.constant dense<0.000000e+00> : vector<8x128xf32>
    %2 = tpu.matmul %0, %1, %cst {dimension_numbers = #tpu.dot_dimension_numbers<[1], [0], [0], [1], [0, 0, 1, 1], [], []>} : vector<8x12xbf16>, vector<12x128xbf16>, vector<8x128xf32> -> vector<8x128xf32>
    %c0_3 = arith.constant 0 : index
    %c0_4 = arith.constant 0 : index
    %3 = vector.load %arg3[%c0_3, %c0_4] : memref<1x128xf32, #tpu.memory_space<vmem>>, vector<1x128xf32>
    %4 = vector.broadcast %3 : vector<1x128xf32> to vector<8x128xf32>
    %5 = arith.mulf %2, %4 : vector<8x128xf32>
    %c0_5 = arith.constant 0 : index
    %c0_6 = arith.constant 0 : index
    %6 = vector.load %arg4[%c0_5, %c0_6] : memref<1x128xf32, #tpu.memory_space<vmem>>, vector<1x128xf32>
    %7 = vector.broadcast %6 : vector<1x128xf32> to vector<8x128xf32>
    %8 = arith.addf %5, %7 : vector<8x128xf32>
    %cst_7 = arith.constant 0.000000e+00 : f32
    %9 = vector.broadcast %cst_7 : f32 to vector<8x128xf32>
    %10 = arith.maximumf %8, %9 : vector<8x128xf32>
    %11 = arith.truncf %10 : vector<8x128xf32> to vector<8x128xbf16>
    %c0_8 = arith.constant 0 : index
    %c0_9 = arith.constant 0 : index
    %12 = vector.load %arg5[%c0_8, %c0_9] : memref<128x128xbf16, #tpu.memory_space<vmem>>, vector<128x128xbf16>
    %cst_10 = arith.constant dense<0.000000e+00> : vector<8x128xf32>
    %13 = tpu.matmul %11, %12, %cst_10 {dimension_numbers = #tpu.dot_dimension_numbers<[1], [0], [0], [1], [0, 0, 1, 1], [], []>} : vector<8x128xbf16>, vector<128x128xbf16>, vector<8x128xf32> -> vector<8x128xf32>
    %c0_11 = arith.constant 0 : index
    %c0_12 = arith.constant 0 : index
    %14 = vector.load %arg6[%c0_11, %c0_12] : memref<1x128xf32, #tpu.memory_space<vmem>>, vector<1x128xf32>
    %15 = vector.broadcast %14 : vector<1x128xf32> to vector<8x128xf32>
    %16 = arith.mulf %13, %15 : vector<8x128xf32>
    %c0_13 = arith.constant 0 : index
    %c0_14 = arith.constant 0 : index
    %17 = vector.load %arg7[%c0_13, %c0_14] : memref<1x128xf32, #tpu.memory_space<vmem>>, vector<1x128xf32>
    %18 = vector.broadcast %17 : vector<1x128xf32> to vector<8x128xf32>
    %19 = arith.addf %16, %18 : vector<8x128xf32>
    %cst_15 = arith.constant 0.000000e+00 : f32
    %20 = vector.broadcast %cst_15 : f32 to vector<8x128xf32>
    %21 = arith.maximumf %19, %20 : vector<8x128xf32>
    %22 = arith.truncf %21 : vector<8x128xf32> to vector<8x128xbf16>
    %c0_16 = arith.constant 0 : index
    %c0_17 = arith.constant 0 : index
    %23 = vector.load %arg8[%c0_16, %c0_17] : memref<128x64xbf16, #tpu.memory_space<vmem>>, vector<128x64xbf16>
    %cst_18 = arith.constant dense<0.000000e+00> : vector<8x64xf32>
    %24 = tpu.matmul %22, %23, %cst_18 {dimension_numbers = #tpu.dot_dimension_numbers<[1], [0], [0], [1], [0, 0, 1, 1], [], []>} : vector<8x128xbf16>, vector<128x64xbf16>, vector<8x64xf32> -> vector<8x64xf32>
    %c0_19 = arith.constant 0 : index
    %c0_20 = arith.constant 0 : index
    %25 = vector.load %arg9[%c0_19, %c0_20] : memref<1x64xf32, #tpu.memory_space<vmem>>, vector<1x64xf32>
    %26 = vector.broadcast %25 : vector<1x64xf32> to vector<8x64xf32>
    %27 = arith.mulf %24, %26 : vector<8x64xf32>
    %c0_21 = arith.constant 0 : index
    %c0_22 = arith.constant 0 : index
    %28 = vector.load %arg10[%c0_21, %c0_22] : memref<1x64xf32, #tpu.memory_space<vmem>>, vector<1x64xf32>
    %29 = vector.broadcast %28 : vector<1x64xf32> to vector<8x64xf32>
    %30 = arith.addf %27, %29 : vector<8x64xf32>
    %cst_23 = arith.constant 0.000000e+00 : f32
    %31 = vector.broadcast %cst_23 : f32 to vector<8x64xf32>
    %32 = arith.maximumf %30, %31 : vector<8x64xf32>
    %c0_24 = arith.constant 0 : index
    %c0_25 = arith.constant 0 : index
    %33 = vector.load %arg11[%c0_24, %c0_25] : memref<8x64xf32, #tpu.memory_space<vmem>>, vector<8x64xf32>
    tpu.vector_store %arg11[%c0_24, %c0_25], %32 {strides = array<i32>} : memref<8x64xf32, #tpu.memory_space<vmem>>, vector<8x64xf32>,
    return
  }
  func.func @transform_0(%arg0: i32) -> (i32, i32) {
    %c0_i32 = arith.constant 0 : i32
    %c0_i32_0 = arith.constant 0 : i32
    return %arg0, %c0_i32 : i32, i32
  }
  func.func @transform_1(%arg0: i32) -> (i32, i32) {
    %c0_i32 = arith.constant 0 : i32
    %c0_i32_0 = arith.constant 0 : i32
    %c0_i32_1 = arith.constant 0 : i32
    return %c0_i32, %c0_i32_0 : i32, i32
  }
  func.func @transform_2(%arg0: i32) -> (i32, i32) {
    %c0_i32 = arith.constant 0 : i32
    %c0_i32_0 = arith.constant 0 : i32
    %c0_i32_1 = arith.constant 0 : i32
    return %c0_i32, %c0_i32_0 : i32, i32
  }
  func.func @transform_3(%arg0: i32) -> (i32, i32) {
    %c0_i32 = arith.constant 0 : i32
    %c0_i32_0 = arith.constant 0 : i32
    %c0_i32_1 = arith.constant 0 : i32
    return %c0_i32, %c0_i32_0 : i32, i32
  }
  func.func @transform_4(%arg0: i32) -> (i32, i32) {
    %c0_i32 = arith.constant 0 : i32
    %c0_i32_0 = arith.constant 0 : i32
    %c0_i32_1 = arith.constant 0 : i32
    return %c0_i32, %c0_i32_0 : i32, i32
  }
  func.func @transform_5(%arg0: i32) -> (i32, i32) {
    %c0_i32 = arith.constant 0 : i32
    %c0_i32_0 = arith.constant 0 : i32
    %c0_i32_1 = arith.constant 0 : i32
    return %c0_i32, %c0_i32_0 : i32, i32
  }
  func.func @transform_6(%arg0: i32) -> (i32, i32) {
    %c0_i32 = arith.constant 0 : i32
    %c0_i32_0 = arith.constant 0 : i32
    %c0_i32_1 = arith.constant 0 : i32
    return %c0_i32, %c0_i32_0 : i32, i32
  }
  func.func @transform_7(%arg0: i32) -> (i32, i32) {
    %c0_i32 = arith.constant 0 : i32
    %c0_i32_0 = arith.constant 0 : i32
    %c0_i32_1 = arith.constant 0 : i32
    return %c0_i32, %c0_i32_0 : i32, i32
  }
  func.func @transform_8(%arg0: i32) -> (i32, i32) {
    %c0_i32 = arith.constant 0 : i32
    %c0_i32_0 = arith.constant 0 : i32
    %c0_i32_1 = arith.constant 0 : i32
    return %c0_i32, %c0_i32_0 : i32, i32
  }
  func.func @transform_9(%arg0: i32) -> (i32, i32) {
    %c0_i32 = arith.constant 0 : i32
    %c0_i32_0 = arith.constant 0 : i32
    %c0_i32_1 = arith.constant 0 : i32
    return %c0_i32, %c0_i32_0 : i32, i32
  }
  func.func @transform_10(%arg0: i32) -> (i32, i32) {
    %c0_i32 = arith.constant 0 : i32
    %c0_i32_0 = arith.constant 0 : i32
    return %arg0, %c0_i32 : i32, i32
  }
}

</mosaic_0001>

<bundles_post_ra>
// kernel: tpu_custom_call.1
= control target key start
LH: loop header
LB: loop body
LE: loop exit
PB: predicated region body
PF: predicated region fallthrough
CT: control target
= control target key end

     0   :  { %vm49_vm0 = vcmask 1045504   ;;  %v502_v0 = vmov 0.0   ;;  %vm503_vm1 = vmmov 0   ;;  %vm45_vm2 = vcmask 97280   ;;  %s655_s0 = inlined_call_operand.vmem [shape: bf16[8,12], index: 0, kind: input, shape index: {}]   ;;  %s656_s1 = inlined_call_operand.vmem [shape: bf16[12,128], index: 1, kind: input, shape index: {}]   ;;  %s657_s2 = inlined_call_operand.vmem [shape: f32[1,128], index: 2, kind: input, shape index: {}]   ;;  %s658_s3 = inlined_call_operand.vmem [shape: f32[1,128], index: 3, kind: input, shape index: {}]   ;;  %s659_s4 = inlined_call_operand.vmem [shape: bf16[128,128], index: 4, kind: input, shape index: {}]   ;;  %s660_s5 = inlined_call_operand.vmem [shape: f32[1,128], index: 5, kind: input, shape index: {}]   ;;  %s661_s6 = inlined_call_operand.vmem [shape: f32[1,128], index: 6, kind: input, shape index: {}]   ;;  %s662_s7 = inlined_call_operand.vmem [shape: bf16[128,64], index: 7, kind: input, shape index: {}]   ;;  %s663_s8 = inlined_call_operand.vmem [shape: f32[1,64], index: 8, kind: input, shape index: {}]   ;;  %s664_s9 = inlined_call_operand.vmem [shape: f32[1,64], index: 9, kind: input, shape index: {}]   ;;  %s665_s10 = inlined_call_operand.hbm [shape: f32[8,64], index: 10, kind: output, shape index: {}]  }
   0x1   :  { %414 = vmatprep.subr.bf16.mxu0 %v502_v0  ;;  %v463_v1 = vld [vmem:[%s656_s1] sm:$0x3f]   ;;  %420 = vmatprep.subr.bf16.mxu1 %v502_v0  ;;  %v464_v3 = vld [vmem:[%s659_s4 + $0x38] sm:$0xff]   ;;  %v465_v5 = vld [vmem:[%s659_s4 + $0x30] sm:$0xff]  }
   0x2   :  { %416 = vmatprep.mubr.msk.bf16.mxu0 %vm503_vm1, %v502_v0  ;;  %v37_v2 = vld [vmem:[%s655_s0] sm:$0xf]  ;;  %436 = vmatprep.mubr.msk.bf16.mxu1 %vm503_vm1, %v502_v0  ;;  %v51_v4 = vsel %vm49_vm0, %v463_v1, 0  ;;  %v466_v6 = vld [vmem:[%s659_s4 + $0x28] sm:$0xff]  }
   0x3   :  { %415 = vmatpush3.bf16.msra.mxu0 %v51_v4  ;;  %421 = vmatpush3.bf16.msra.mxu1 %v464_v3  ;;  %v467_v7 = vld [vmem:[%s659_s4 + $0x20] sm:$0xff]  }
   0x4   :  { %422 = vmatprep.subr.bf16.mxu1 %v502_v0  ;;  %440 = vmatprep.subr.bf16.mxu0 %v502_v0 }
   0x6   :  { %417 = vmatmul.mubr.msk.bf16.vlgmr.msra.gmra.mxu0 %vm45_vm2, %v37_v2 }
   0x7   :  { %423 = vmatpush3.bf16.msra.mxu1 %v465_v5  ;;  %456 = vmatprep.mubr.msk.bf16.mxu0 %vm503_vm1, %v502_v0 }
   0x8   :  { %424 = vmatprep.subr.bf16.mxu1 %v502_v0 }
   0xb   :  { %425 = vmatpush3.bf16.msra.mxu1 %v466_v6 }
   0xc   :  { %426 = vmatprep.subr.bf16.mxu1 %v502_v0 }
   0xd   :  { %15 = vsyncpa [#allocation3], 0  ;;  %v468_v8 = vld [vmem:[%s659_s4 + $0x18] sm:$0xff]   ;;  %v469_v9 = vld [vmem:[%s659_s4 + $0x10] sm:$0xff]   ;;  %vm354_vm3 = vcmask 523264  }
   0xe   :  { %v470_v10 = vld [vmem:[%s659_s4 + $0x8] sm:$0xff]   ;;  %v471_v11 = vld [vmem:[%s659_s4] sm:$0xff]   ;;  %v472_v12 = vld [vmem:[%s662_s7 + $0x38] sm:$0xff]  }
   0xf   :  { %427 = vmatpush3.bf16.msra.mxu1 %v467_v7  ;;  %441 = vmatpush3.bf16.msra.mxu0 %v472_v12  ;;  %v473_v13 = vld [vmem:[%s662_s7 + $0x30] sm:$0xff]   ;;  %v474_v14 = vld [vmem:[%s662_s7 + $0x28] sm:$0xff]   ;;  %v475_v15 = vld [vmem:[%s662_s7 + $0x20] sm:$0xff]  }
  0x10   :  { %428 = vmatprep.subr.bf16.mxu1 %v502_v0  ;;  %442 = vmatprep.subr.bf16.mxu0 %v502_v0  ;;  %v476_v16 = vld [vmem:[%s662_s7 + $0x18] sm:$0xff]   ;;  %v477_v17 = vld [vmem:[%s662_s7 + $0x10] sm:$0xff]   ;;  %v372_v18 = vld [vmem:[%s657_s2] ss:$0 sm:$0xff] }
  0x11   :  { %v373_v20 = vld [vmem:[%s658_s3] ss:$0 sm:$0xff]  ;;  %v478_v28 = vld [vmem:[%s662_s7 + $0x8] sm:$0xff]  }
  0x12   :  { %v479_v29 = vld [vmem:[%s662_s7] sm:$0xff]  }
  0x13   :  { %429 = vmatpush3.bf16.msra.mxu1 %v468_v8  ;;  %443 = vmatpush3.bf16.msra.mxu0 %v473_v13  ;;  %v382_v30 = vld [vmem:[%s660_s5] ss:$0 sm:$0xff] }
  0x14   :  { %430 = vmatprep.subr.bf16.mxu1 %v502_v0  ;;  %444 = vmatprep.subr.bf16.mxu0 %v502_v0  ;;  %v383_v32 = vld [vmem:[%s661_s6] ss:$0 sm:$0xff]  ;;  %s504_s6 = smov [#allocation2]  }
  0x15   :  { %v392_v40 = vld [vmem:[%s663_s8] ss:$0 sm:$0xff]  ;;  %s362_s12 = sshll.u32 %s504_s6, 4  ;;  %s363_s12 = int_to_ptr.vmem [resolvable:$true] %s362_s12 }
  0x16   :  { %v393_v42 = vld [vmem:[%s664_s9] ss:$0 sm:$0xff]  ;;  %s480_s13 = scalar_lea.vmem %s363_s12, 128  ;;  %p485_p1 = scmp.lt.s32.totalorder %s363_s12, %s363_s12 }
  0x17   :  { %431 = vmatpush3.bf16.msra.mxu1 %v469_v9  ;;  %445 = vmatpush3.bf16.msra.mxu0 %v474_v14  ;;  %p481_p0 = scmp.ne.s32.totalorder %s363_s12, %s480_s13  ;;  %p486_p2 = scmp.lt.s32.totalorder %s480_s13, %s480_s13 }
  0x18   :  { %432 = vmatprep.subr.bf16.mxu1 %v502_v0  ;;  %446 = vmatprep.subr.bf16.mxu0 %v502_v0 }
  0x19   :  { %p487_p3 = por %p486_p2, %p485_p1 }
  0x1b   :  { %433 = vmatpush3.bf16.msra.mxu1 %v470_v10  ;;  %447 = vmatpush3.bf16.msra.mxu0 %v475_v15  ;;  %p488_p4 = pnand %p487_p3, %p481_p0 }
  0x1c   :  { %434 = vmatprep.subr.bf16.mxu1 %v502_v0  ;;  %448 = vmatprep.subr.bf16.mxu0 %v502_v0 }
  0x1f   :  { %435 = vmatpush3.bf16.msra.mxu1 %v471_v11  ;;  %449 = vmatpush3.bf16.msra.mxu0 %v476_v16 }
  0x20   :  { %450 = vmatprep.subr.bf16.mxu0 %v502_v0 }
  0x23   :  { %451 = vmatpush3.bf16.msra.mxu0 %v477_v17 }
  0x24   :  { %452 = vmatprep.subr.bf16.mxu0 %v502_v0 }
  0x27   :  { %453 = vmatpush3.bf16.msra.mxu0 %v478_v28 }
  0x28   :  { %454 = vmatprep.subr.bf16.mxu0 %v502_v0 }
  0x2b   :  { %455 = vmatpush3.bf16.msra.mxu0 %v479_v29 }
  0xc6   :  { %v87_v19 = vpop.f32.mrf.mxu0 }
  0xc7   :  { %v100_v21 = vmul.f32 %v372_v18, %v87_v19 }
  0xc8   :  { %v418_v22 = vpop.f32.mrf.mxu0 }
  0xc9   :  { %v108_v23 = vadd.f32 %v373_v20, %v100_v21 }
  0xca   :  { %v90_v24 = vpop.f32.mrf.mxu0 }
  0xcb   :  { %v109_v25 = vmax.f32 %v108_v23, 0.0 }
  0xcc   :  { %v419_v26 = vpop.f32.mrf.mxu0 }
  0xcd   :  { %v110_v27 = vpack.c.bf16 %v109_v25, %v109_v25 }
  0xcf   :  { %437 = vmatmul.mubr.bf16.vlgmr.msra.gmra.mxu1 %v110_v27 }
 0x18f   :  { %v209_v31 = vpop.f32.mrf.mxu1 }
 0x190   :  { %v222_v33 = vmul.f32 %v382_v30, %v209_v31 }
 0x191   :  { %v438_v34 = vpop.f32.mrf.mxu1 }
 0x192   :  { %v230_v35 = vadd.f32 %v383_v32, %v222_v33 }
 0x193   :  { %v212_v36 = vpop.f32.mrf.mxu1 }
 0x194   :  { %v231_v37 = vmax.f32 %v230_v35, 0.0 }
 0x195   :  { %v439_v38 = vpop.f32.mrf.mxu1 }
 0x196   :  { %v232_v39 = vpack.c.bf16 %v231_v37, %v231_v37 }
 0x198   :  { %457 = vmatmul.mubr.bf16.vlgmr.msra.gmra.mxu0 %v232_v39 }
 0x258   :  { %v331_v41 = vpop.f32.mrf.mxu0 }
 0x259   :  { %v344_v43 = vmul.f32 %v392_v40, %v331_v41 }
 0x25a   :  { %v458_v44 = vpop.f32.mrf.mxu0 }
 0x25b   :  { %v352_v45 = vadd.f32 %v393_v42, %v344_v43 }
 0x25c   :  { %v334_v46 = vpop.f32.mrf.mxu0 }
 0x25d   :  { %v353_v47 = vmax.f32 %v352_v45, 0.0 }
 0x25e   :  { %v459_v48 = vpop.f32.mrf.mxu0 }
 0x25f   :  { %355 = vst.msk [vmem:[#allocation2] sm:$0xff] %vm354_vm3, %v353_v47 }
 0x260   :  { %491 = shalt.err (!%p488_p4)
}
 0x261   :  { %365 = dma.vmem_to_hbm [thread:$0]  %s363_s12, 128, %s665_s10, [#allocation3]  }
 0x262   :  { %500 = dma.done.wait [#allocation3], 128  }
 0x263   :  { %501 = vsyncadd [#allocation3], 4294967168 }
 0x264   :  { %369 = vsyncpa [#allocation3], 1 }

</bundles_post_ra>
